<compile_context>
chip_gen: v7x
topology: tpu7x:2x2x1
jax: 0.10.0
libtpu: 0.0.40
codegen_flags: <defaults>
</compile_context>

<pallas_src>
import numpy as np
import jax
import jax.numpy as jnp
from jax.experimental import pallas as pl
from jax.experimental.pallas import tpu as pltpu

LN_EPS = 1e-5


def _round_up(x, m):
    return (x + m - 1) // m * m


def _full_spec(shape):
    nd = len(shape)
    return pl.BlockSpec(shape, lambda i, _nd=nd: (0,) * _nd)


def _build_schedule(limits):
    """Static pairing schedule for the per-segment queue reduction.

    Node ids [0, N) are the input rows; each level's results occupy a fresh
    8-row-aligned region appended after the inputs.  Returns
    (n_pad, total_nodes, levels, roots) with levels = [(region_base, [(l, r), ...])]."""
    limits = np.asarray(limits, dtype=np.int64)
    n = int(limits[-1])
    n_seg = len(limits) - 1
    queues = [list(range(int(limits[i]), int(limits[i + 1]))) for i in range(n_seg)]
    n_pad = _round_up(max(n, 1), 8)
    levels = []
    next_base = n_pad
    while any(len(q) > 1 for q in queues):
        base = next_base
        pairs = []
        new_queues = []
        for q in queues:
            if len(q) <= 1:
                new_queues.append(q)
                continue
            npairs = len(q) // 2
            dsts = []
            for p in range(npairs):
                dsts.append(base + len(pairs))
                pairs.append((q[2 * p], q[2 * p + 1]))
            # unpaired odd element leads the next round (matches the reference's
            # start_inds -> old end_inds index math); results are appended after it.
            new_queues.append(q[2 * npairs:] + dsts)
        queues = new_queues
        levels.append((base, pairs))
        next_base = base + _round_up(len(pairs), 8)
    roots = [q[0] for q in queues]
    return n_pad, next_base, levels, roots


def _make_kernel(n_pad, levels, roots, dim):
    """Build the fused kernel for a fixed (static) schedule."""

    def kernel(args_ref, w1a_ref, w1b_ref, b1_ref, w2_ref, b2_ref, g_ref, bt_ref,
               o_ref, nodes, lbuf, rbuf):
        # Stage all input rows into the persistent node buffer; zero the gather
        # scratch once so padded rows are deterministic (they never reach valid
        # outputs anyway — all per-row math is row-wise).
        nodes[0:n_pad, :] = args_ref[...]
        lbuf[...] = jnp.zeros_like(lbuf)
        rbuf[...] = jnp.zeros_like(rbuf)

        # Hoist all parameter loads out of the level loop (DMA'd once, stay resident).
        w1a = w1a_ref[...]          # bf16 (dim, 2*dim)   top half of W1 (left operand)
        w1b = w1b_ref[...]          # bf16 (dim, 2*dim)   bottom half of W1 (right)
        b1 = b1_ref[...]            # f32  (1, 2*dim)
        w2 = w2_ref[...]            # bf16 (2*dim, dim)
        b2 = b2_ref[...]            # f32  (1, dim)
        gamma = g_ref[...]          # f32  (1, dim)
        beta = bt_ref[...]          # f32  (1, dim)

        for base, pairs in levels:                      # static -> fully unrolled
            npairs = len(pairs)
            np_pad = _round_up(npairs, 8)
            # Static gather of this level's (left, right) rows into contiguous,
            # sublane-padded batches (static slices: zero index arithmetic at runtime).
            for p, (li, ri) in enumerate(pairs):
                lbuf[p:p + 1, :] = nodes[li:li + 1, :]
                rbuf[p:p + 1, :] = nodes[ri:ri + 1, :]
            left = lbuf[0:np_pad, :].astype(jnp.bfloat16)
            right = rbuf[0:np_pad, :].astype(jnp.bfloat16)
            # cat(left, right) @ W1 + b1 == left @ W1[:dim] + right @ W1[dim:] + b1
            h = (jnp.dot(left, w1a, preferred_element_type=jnp.float32)
                 + jnp.dot(right, w1b, preferred_element_type=jnp.float32)
                 + b1)
            h = jnp.tanh(h)                                            # nonlin (TANH)
            y = jnp.dot(h.astype(jnp.bfloat16), w2,
                        preferred_element_type=jnp.float32) + b2
            # LayerNorm over the feature (lane) axis.
            mu = jnp.mean(y, axis=-1, keepdims=True)
            var = jnp.mean(jnp.square(y - mu), axis=-1, keepdims=True)
            yn = (y - mu) * jax.lax.rsqrt(var + LN_EPS) * gamma + beta
            # One contiguous (8-aligned) store per level; padded rows land inside this
            # level's own pad region and are never read back.
            nodes[base:base + np_pad, :] = yn

        # Emit each segment's root row.
        for s, r in enumerate(roots):
            o_ref[s:s + 1, :] = nodes[r:r + 1, :]

    return kernel


def init_params(key, dim):
    """Parameters matching the PyTorch module's shapes (arit = 2).
    first : Linear(2*dim, 2*dim);  second: Linear(2*dim, dim);  epilog: LayerNorm(dim).
    Weights are stored transposed (in, out) and in bf16 (native MXU input format);
    biases / LayerNorm affine stay f32."""
    k1, k2, k3, k4 = jax.random.split(key, 4)
    lim = 1.0 / np.sqrt(2 * dim)
    w1 = jax.random.uniform(k1, (2 * dim, 2 * dim), jnp.float32, -lim, lim)
    b1 = jax.random.uniform(k2, (1, 2 * dim), jnp.float32, -lim, lim)
    w2 = jax.random.uniform(k3, (2 * dim, dim), jnp.float32, -lim, lim)
    b2 = jax.random.uniform(k4, (1, dim), jnp.float32, -lim, lim)
    return {
        "w1a": w1[:dim].astype(jnp.bfloat16),   # top half of W1 (multiplies left row)
        "w1b": w1[dim:].astype(jnp.bfloat16),   # bottom half of W1 (multiplies right)
        "b1": b1,
        "w2": w2.astype(jnp.bfloat16),
        "b2": b2,
        "gamma": jnp.ones((1, dim), jnp.float32),
        "beta": jnp.zeros((1, dim), jnp.float32),
    }


def cat_and_nonlinear_multiary_forward(args, limits, params):
    """args: (N, dim) float; limits: host int array of segment boundaries (len S+1).
    Returns (S, dim) float32 — one fused Pallas call for the whole tree reduction."""
    limits = np.asarray(limits, dtype=np.int64)
    assert np.all(np.diff(limits) >= 1), "empty segments are not supported"
    n = int(limits[-1])
    n_seg = len(limits) - 1
    dim = int(args.shape[-1])

    n_pad, total_nodes, levels, roots = _build_schedule(limits)
    maxp_pad = max([_round_up(len(p), 8) for _, p in levels], default=8)

    args_p = jnp.zeros((n_pad, dim), jnp.float32).at[:n, :].set(args.astype(jnp.float32))
    operands = (args_p, params["w1a"], params["w1b"], params["b1"],
                params["w2"], params["b2"], params["gamma"], params["beta"])

    # Advisory cost estimate + a VMEM budget derived from actual operand/scratch sizes.
    pair_rows = sum(_round_up(len(p), 8) for _, p in levels)
    flops = int(pair_rows * 12 * dim * dim)
    transcendentals = int(pair_rows * 2 * dim)
    op_bytes = sum(int(np.prod(o.shape)) * o.dtype.itemsize for o in operands)
    out_bytes = n_seg * dim * 4
    scratch_bytes = (total_nodes + 2 * maxp_pad) * dim * 4
    vmem_limit = int(max(32 * 1024 * 1024,
                         2 * (op_bytes + out_bytes) + scratch_bytes + (4 << 20)))

    kernel = _make_kernel(n_pad, levels, roots, dim)
    return pl.pallas_call(
        kernel,
        out_shape=jax.ShapeDtypeStruct((n_seg, dim), jnp.float32),
        grid=(1,),
        in_specs=[_full_spec(op.shape) for op in operands],
        out_specs=_full_spec((n_seg, dim)),
        scratch_shapes=[
            pltpu.VMEM((total_nodes, dim), jnp.float32),   # persistent node buffer
            pltpu.VMEM((maxp_pad, dim), jnp.float32),      # gathered left rows
            pltpu.VMEM((maxp_pad, dim), jnp.float32),      # gathered right rows
        ],
        compiler_params=pltpu.CompilerParams(
            dimension_semantics=("arbitrary",),
            vmem_limit_bytes=vmem_limit),
        cost_estimate=pl.CostEstimate(flops=flops, transcendentals=transcendentals,
                                      bytes_accessed=int(op_bytes + out_bytes)),
    )(*operands)


def _forward_reference(args, limits, params):
    """Independent plain-JAX (f32) implementation of the same queue semantics."""
    w1 = jnp.concatenate([params["w1a"], params["w1b"]], axis=0).astype(jnp.float32)
    w2 = params["w2"].astype(jnp.float32)
    b1, b2 = params["b1"], params["b2"]
    gamma, beta = params["gamma"], params["beta"]

    def combine(l, r):
        x = jnp.concatenate([l, r], axis=-1)
        h = jnp.tanh(x @ w1 + b1)
        y = h @ w2 + b2
        mu = jnp.mean(y, axis=-1, keepdims=True)
        var = jnp.mean(jnp.square(y - mu), axis=-1, keepdims=True)
        return (y - mu) * jax.lax.rsqrt(var + LN_EPS) * gamma + beta

    limits = np.asarray(limits, dtype=np.int64)
    outs = []
    for i in range(len(limits) - 1):
        queue = [args[j].astype(jnp.float32)
                 for j in range(int(limits[i]), int(limits[i + 1]))]
        while len(queue) > 1:
            npairs = len(queue) // 2
            res = [combine(queue[2 * p][None, :], queue[2 * p + 1][None, :])[0]
                   for p in range(npairs)]
            queue = queue[2 * npairs:] + res   # odd carry leads the next round
        outs.append(queue[0])
    return jnp.stack(outs, axis=0)


if __name__ == "__main__":
    dim = 128          # HP.EMBED_SIZE; 128 keeps every row lane-dense (unmasked stores)
    key = jax.random.PRNGKey(0)
    k_params, k_args = jax.random.split(key)
    params = init_params(k_params, dim)

    # Segments of lengths 5, 1, 4, 3 -> 13 input rows, 4 output rows.
    limits = np.array([0, 5, 6, 10, 13], dtype=np.int64)
    args = jax.random.normal(k_args, (int(limits[-1]), dim), dtype=jnp.float32)

    out = jax.block_until_ready(cat_and_nonlinear_multiary_forward(args, limits, params))
    assert out.shape == (len(limits) - 1, dim)

    # Cross-check against an independent plain-JAX f32 reference (kernel uses bf16
    # matmul inputs with f32 accumulation, hence the loose tolerance).
    out_ref = jax.block_until_ready(_forward_reference(args, limits, params))
    np.testing.assert_allclose(np.asarray(out), np.asarray(out_ref), rtol=2e-2, atol=2e-2)

    print("KERNEL_OK")
</pallas_src>

<mosaic_0001>
module attributes {stable_mosaic.version = 11 : i64} {
  func.func @kernel(%arg0: i32, %arg1: memref<16x128xf32, #tpu.memory_space<vmem>>, %arg2: memref<128x256xbf16, #tpu.memory_space<vmem>>, %arg3: memref<128x256xbf16, #tpu.memory_space<vmem>>, %arg4: memref<1x256xf32, #tpu.memory_space<vmem>>, %arg5: memref<256x128xbf16, #tpu.memory_space<vmem>>, %arg6: memref<1x128xf32, #tpu.memory_space<vmem>>, %arg7: memref<1x128xf32, #tpu.memory_space<vmem>>, %arg8: memref<1x128xf32, #tpu.memory_space<vmem>>, %arg9: memref<4x128xf32, #tpu.memory_space<vmem>>, %arg10: memref<40x128xf32, #tpu.memory_space<vmem>>, %arg11: memref<8x128xf32, #tpu.memory_space<vmem>>, %arg12: memref<8x128xf32, #tpu.memory_space<vmem>>) attributes {dimension_semantics = [#tpu.dimension_semantics<arbitrary>], iteration_bounds = array<i64: 1>, scalar_prefetch = 0 : i64, scratch_operands = 3 : i64, tpu.core_type = #tpu.core_type<tc>, window_params = [{pipeline_mode = #tpu.pipeline_mode<synchronous>, transform_indices = @transform_0, window_bounds = array<i64: 16, 128>}, {pipeline_mode = #tpu.pipeline_mode<synchronous>, transform_indices = @transform_1, window_bounds = array<i64: 128, 256>}, {pipeline_mode = #tpu.pipeline_mode<synchronous>, transform_indices = @transform_2, window_bounds = array<i64: 128, 256>}, {pipeline_mode = #tpu.pipeline_mode<synchronous>, transform_indices = @transform_3, window_bounds = array<i64: 1, 256>}, {pipeline_mode = #tpu.pipeline_mode<synchronous>, transform_indices = @transform_4, window_bounds = array<i64: 256, 128>}, {pipeline_mode = #tpu.pipeline_mode<synchronous>, transform_indices = @transform_5, window_bounds = array<i64: 1, 128>}, {pipeline_mode = #tpu.pipeline_mode<synchronous>, transform_indices = @transform_6, window_bounds = array<i64: 1, 128>}, {pipeline_mode = #tpu.pipeline_mode<synchronous>, transform_indices = @transform_7, window_bounds = array<i64: 1, 128>}, {pipeline_mode = #tpu.pipeline_mode<synchronous>, transform_indices = @transform_8, window_bounds = array<i64: 4, 128>}]} {
    %c0 = arith.constant 0 : index
    %c0_0 = arith.constant 0 : index
    %0 = vector.load %arg1[%c0, %c0_0] : memref<16x128xf32, #tpu.memory_space<vmem>>, vector<16x128xf32>
    %c0_1 = arith.constant 0 : index
    %c0_2 = arith.constant 0 : index
    %1 = vector.load %arg10[%c0_1, %c0_2] : memref<40x128xf32, #tpu.memory_space<vmem>>, vector<16x128xf32>
    tpu.vector_store %arg10[%c0_1, %c0_2], %0 {strides = array<i32>} : memref<40x128xf32, #tpu.memory_space<vmem>>, vector<16x128xf32>,
    %cst = arith.constant 0.000000e+00 : f32
    %2 = vector.broadcast %cst : f32 to vector<8x128xf32>
    %c0_3 = arith.constant 0 : index
    %c0_4 = arith.constant 0 : index
    %3 = vector.load %arg11[%c0_3, %c0_4] : memref<8x128xf32, #tpu.memory_space<vmem>>, vector<8x128xf32>
    tpu.vector_store %arg11[%c0_3, %c0_4], %2 {strides = array<i32>} : memref<8x128xf32, #tpu.memory_space<vmem>>, vector<8x128xf32>,
    %cst_5 = arith.constant 0.000000e+00 : f32
    %4 = vector.broadcast %cst_5 : f32 to vector<8x128xf32>
    %c0_6 = arith.constant 0 : index
    %c0_7 = arith.constant 0 : index
    %5 = vector.load %arg12[%c0_6, %c0_7] : memref<8x128xf32, #tpu.memory_space<vmem>>, vector<8x128xf32>
    tpu.vector_store %arg12[%c0_6, %c0_7], %4 {strides = array<i32>} : memref<8x128xf32, #tpu.memory_space<vmem>>, vector<8x128xf32>,
    %c0_8 = arith.constant 0 : index
    %c0_9 = arith.constant 0 : index
    %6 = vector.load %arg2[%c0_8, %c0_9] : memref<128x256xbf16, #tpu.memory_space<vmem>>, vector<128x256xbf16>
    %c0_10 = arith.constant 0 : index
    %c0_11 = arith.constant 0 : index
    %7 = vector.load %arg3[%c0_10, %c0_11] : memref<128x256xbf16, #tpu.memory_space<vmem>>, vector<128x256xbf16>
    %c0_12 = arith.constant 0 : index
    %c0_13 = arith.constant 0 : index
    %8 = vector.load %arg4[%c0_12, %c0_13] : memref<1x256xf32, #tpu.memory_space<vmem>>, vector<1x256xf32>
    %c0_14 = arith.constant 0 : index
    %c0_15 = arith.constant 0 : index
    %9 = vector.load %arg5[%c0_14, %c0_15] : memref<256x128xbf16, #tpu.memory_space<vmem>>, vector<256x128xbf16>
    %c0_16 = arith.constant 0 : index
    %c0_17 = arith.constant 0 : index
    %10 = vector.load %arg6[%c0_16, %c0_17] : memref<1x128xf32, #tpu.memory_space<vmem>>, vector<1x128xf32>
    %c0_18 = arith.constant 0 : index
    %c0_19 = arith.constant 0 : index
    %11 = vector.load %arg7[%c0_18, %c0_19] : memref<1x128xf32, #tpu.memory_space<vmem>>, vector<1x128xf32>
    %c0_20 = arith.constant 0 : index
    %c0_21 = arith.constant 0 : index
    %12 = vector.load %arg8[%c0_20, %c0_21] : memref<1x128xf32, #tpu.memory_space<vmem>>, vector<1x128xf32>
    %c0_22 = arith.constant 0 : index
    %c0_23 = arith.constant 0 : index
    %13 = vector.load %arg10[%c0_22, %c0_23] : memref<40x128xf32, #tpu.memory_space<vmem>>, vector<1x128xf32>
    %c0_24 = arith.constant 0 : index
    %c0_25 = arith.constant 0 : index
    %14 = vector.load %arg11[%c0_24, %c0_25] : memref<8x128xf32, #tpu.memory_space<vmem>>, vector<1x128xf32>
    tpu.vector_store %arg11[%c0_24, %c0_25], %13 {strides = array<i32>} : memref<8x128xf32, #tpu.memory_space<vmem>>, vector<1x128xf32>,
    %c1 = arith.constant 1 : index
    %c0_26 = arith.constant 0 : index
    %15 = vector.load %arg10[%c1, %c0_26] : memref<40x128xf32, #tpu.memory_space<vmem>>, vector<1x128xf32>
    %c0_27 = arith.constant 0 : index
    %c0_28 = arith.constant 0 : index
    %16 = vector.load %arg12[%c0_27, %c0_28] : memref<8x128xf32, #tpu.memory_space<vmem>>, vector<1x128xf32>
    tpu.vector_store %arg12[%c0_27, %c0_28], %15 {strides = array<i32>} : memref<8x128xf32, #tpu.memory_space<vmem>>, vector<1x128xf32>,
    %c2 = arith.constant 2 : index
    %c0_29 = arith.constant 0 : index
    %17 = vector.load %arg10[%c2, %c0_29] : memref<40x128xf32, #tpu.memory_space<vmem>>, vector<1x128xf32>
    %c1_30 = arith.constant 1 : index
    %c0_31 = arith.constant 0 : index
    %18 = vector.load %arg11[%c1_30, %c0_31] : memref<8x128xf32, #tpu.memory_space<vmem>>, vector<1x128xf32>
    tpu.vector_store %arg11[%c1_30, %c0_31], %17 {strides = array<i32>} : memref<8x128xf32, #tpu.memory_space<vmem>>, vector<1x128xf32>,
    %c3 = arith.constant 3 : index
    %c0_32 = arith.constant 0 : index
    %19 = vector.load %arg10[%c3, %c0_32] : memref<40x128xf32, #tpu.memory_space<vmem>>, vector<1x128xf32>
    %c1_33 = arith.constant 1 : index
    %c0_34 = arith.constant 0 : index
    %20 = vector.load %arg12[%c1_33, %c0_34] : memref<8x128xf32, #tpu.memory_space<vmem>>, vector<1x128xf32>
    tpu.vector_store %arg12[%c1_33, %c0_34], %19 {strides = array<i32>} : memref<8x128xf32, #tpu.memory_space<vmem>>, vector<1x128xf32>,
    %c6 = arith.constant 6 : index
    %c0_35 = arith.constant 0 : index
    %21 = vector.load %arg10[%c6, %c0_35] : memref<40x128xf32, #tpu.memory_space<vmem>>, vector<1x128xf32>
    %c2_36 = arith.constant 2 : index
    %c0_37 = arith.constant 0 : index
    %22 = vector.load %arg11[%c2_36, %c0_37] : memref<8x128xf32, #tpu.memory_space<vmem>>, vector<1x128xf32>
    tpu.vector_store %arg11[%c2_36, %c0_37], %21 {strides = array<i32>} : memref<8x128xf32, #tpu.memory_space<vmem>>, vector<1x128xf32>,
    %c7 = arith.constant 7 : index
    %c0_38 = arith.constant 0 : index
    %23 = vector.load %arg10[%c7, %c0_38] : memref<40x128xf32, #tpu.memory_space<vmem>>, vector<1x128xf32>
    %c2_39 = arith.constant 2 : index
    %c0_40 = arith.constant 0 : index
    %24 = vector.load %arg12[%c2_39, %c0_40] : memref<8x128xf32, #tpu.memory_space<vmem>>, vector<1x128xf32>
    tpu.vector_store %arg12[%c2_39, %c0_40], %23 {strides = array<i32>} : memref<8x128xf32, #tpu.memory_space<vmem>>, vector<1x128xf32>,
    %c8 = arith.constant 8 : index
    %c0_41 = arith.constant 0 : index
    %25 = vector.load %arg10[%c8, %c0_41] : memref<40x128xf32, #tpu.memory_space<vmem>>, vector<1x128xf32>
    %c3_42 = arith.constant 3 : index
    %c0_43 = arith.constant 0 : index
    %26 = vector.load %arg11[%c3_42, %c0_43] : memref<8x128xf32, #tpu.memory_space<vmem>>, vector<1x128xf32>
    tpu.vector_store %arg11[%c3_42, %c0_43], %25 {strides = array<i32>} : memref<8x128xf32, #tpu.memory_space<vmem>>, vector<1x128xf32>,
    %c9 = arith.constant 9 : index
    %c0_44 = arith.constant 0 : index
    %27 = vector.load %arg10[%c9, %c0_44] : memref<40x128xf32, #tpu.memory_space<vmem>>, vector<1x128xf32>
    %c3_45 = arith.constant 3 : index
    %c0_46 = arith.constant 0 : index
    %28 = vector.load %arg12[%c3_45, %c0_46] : memref<8x128xf32, #tpu.memory_space<vmem>>, vector<1x128xf32>
    tpu.vector_store %arg12[%c3_45, %c0_46], %27 {strides = array<i32>} : memref<8x128xf32, #tpu.memory_space<vmem>>, vector<1x128xf32>,
    %c10 = arith.constant 10 : index
    %c0_47 = arith.constant 0 : index
    %29 = vector.load %arg10[%c10, %c0_47] : memref<40x128xf32, #tpu.memory_space<vmem>>, vector<1x128xf32>
    %c4 = arith.constant 4 : index
    %c0_48 = arith.constant 0 : index
    %30 = vector.load %arg11[%c4, %c0_48] : memref<8x128xf32, #tpu.memory_space<vmem>>, vector<1x128xf32>
    tpu.vector_store %arg11[%c4, %c0_48], %29 {strides = array<i32>} : memref<8x128xf32, #tpu.memory_space<vmem>>, vector<1x128xf32>,
    %c11 = arith.constant 11 : index
    %c0_49 = arith.constant 0 : index
    %31 = vector.load %arg10[%c11, %c0_49] : memref<40x128xf32, #tpu.memory_space<vmem>>, vector<1x128xf32>
    %c4_50 = arith.constant 4 : index
    %c0_51 = arith.constant 0 : index
    %32 = vector.load %arg12[%c4_50, %c0_51] : memref<8x128xf32, #tpu.memory_space<vmem>>, vector<1x128xf32>
    tpu.vector_store %arg12[%c4_50, %c0_51], %31 {strides = array<i32>} : memref<8x128xf32, #tpu.memory_space<vmem>>, vector<1x128xf32>,
    %c0_52 = arith.constant 0 : index
    %c0_53 = arith.constant 0 : index
    %33 = vector.load %arg11[%c0_52, %c0_53] : memref<8x128xf32, #tpu.memory_space<vmem>>, vector<8x128xf32>
    %34 = arith.truncf %33 : vector<8x128xf32> to vector<8x128xbf16>
    %c0_54 = arith.constant 0 : index
    %c0_55 = arith.constant 0 : index
    %35 = vector.load %arg12[%c0_54, %c0_55] : memref<8x128xf32, #tpu.memory_space<vmem>>, vector<8x128xf32>
    %36 = arith.truncf %35 : vector<8x128xf32> to vector<8x128xbf16>
    %cst_56 = arith.constant dense<0.000000e+00> : vector<8x256xf32>
    %37 = tpu.matmul %34, %6, %cst_56 {dimension_numbers = #tpu.dot_dimension_numbers<[1], [0], [0], [1], [0, 0, 1, 1], [], []>} : vector<8x128xbf16>, vector<128x256xbf16>, vector<8x256xf32> -> vector<8x256xf32>
    %cst_57 = arith.constant dense<0.000000e+00> : vector<8x256xf32>
    %38 = tpu.matmul %36, %7, %cst_57 {dimension_numbers = #tpu.dot_dimension_numbers<[1], [0], [0], [1], [0, 0, 1, 1], [], []>} : vector<8x128xbf16>, vector<128x256xbf16>, vector<8x256xf32> -> vector<8x256xf32>
    %39 = arith.addf %37, %38 : vector<8x256xf32>
    %40 = vector.broadcast %8 : vector<1x256xf32> to vector<8x256xf32>
    %41 = arith.addf %39, %40 : vector<8x256xf32>
    %42 = math.tanh %41 : vector<8x256xf32>
    %43 = arith.truncf %42 : vector<8x256xf32> to vector<8x256xbf16>
    %cst_58 = arith.constant dense<0.000000e+00> : vector<8x128xf32>
    %44 = tpu.matmul %43, %9, %cst_58 {dimension_numbers = #tpu.dot_dimension_numbers<[1], [0], [0], [1], [0, 0, 1, 1], [], []>} : vector<8x256xbf16>, vector<256x128xbf16>, vector<8x128xf32> -> vector<8x128xf32>
    %45 = vector.broadcast %10 : vector<1x128xf32> to vector<8x128xf32>
    %46 = arith.addf %44, %45 : vector<8x128xf32>
    %cst_59 = arith.constant dense<0.000000e+00> : vector<8xf32>
    %47 = vector.multi_reduction <add>, %46, %cst_59 [1] : vector<8x128xf32> to vector<8xf32>
    %48 = vector.shape_cast %47 : vector<8xf32> to vector<8x1xf32>
    %cst_60 = arith.constant 1.280000e+02 : f32
    %49 = vector.broadcast %cst_60 : f32 to vector<8x1xf32>
    %50 = arith.divf %48, %49 : vector<8x1xf32>
    %51 = vector.broadcast %50 : vector<8x1xf32> to vector<8x128xf32>
    %52 = arith.subf %46, %51 : vector<8x128xf32>
    %53 = arith.mulf %52, %52 : vector<8x128xf32>
    %cst_61 = arith.constant dense<0.000000e+00> : vector<8xf32>
    %54 = vector.multi_reduction <add>, %53, %cst_61 [1] : vector<8x128xf32> to vector<8xf32>
    %55 = vector.shape_cast %54 : vector<8xf32> to vector<8x1xf32>
    %cst_62 = arith.constant 1.280000e+02 : f32
    %56 = vector.broadcast %cst_62 : f32 to vector<8x1xf32>
    %57 = arith.divf %55, %56 : vector<8x1xf32>
    %58 = vector.broadcast %50 : vector<8x1xf32> to vector<8x128xf32>
    %59 = arith.subf %46, %58 : vector<8x128xf32>
    %cst_63 = arith.constant 9.99999974E-6 : f32
    %60 = vector.broadcast %cst_63 : f32 to vector<8x1xf32>
    %61 = arith.addf %57, %60 : vector<8x1xf32>
    %62 = math.rsqrt %61 : vector<8x1xf32>
    %63 = vector.broadcast %62 : vector<8x1xf32> to vector<8x128xf32>
    %64 = arith.mulf %59, %63 : vector<8x128xf32>
    %65 = vector.broadcast %11 : vector<1x128xf32> to vector<8x128xf32>
    %66 = arith.mulf %64, %65 : vector<8x128xf32>
    %67 = vector.broadcast %12 : vector<1x128xf32> to vector<8x128xf32>
    %68 = arith.addf %66, %67 : vector<8x128xf32>
    %c16 = arith.constant 16 : index
    %c0_64 = arith.constant 0 : index
    %69 = vector.load %arg10[%c16, %c0_64] : memref<40x128xf32, #tpu.memory_space<vmem>>, vector<8x128xf32>
    tpu.vector_store %arg10[%c16, %c0_64], %68 {strides = array<i32>} : memref<40x128xf32, #tpu.memory_space<vmem>>, vector<8x128xf32>,
    %c4_65 = arith.constant 4 : index
    %c0_66 = arith.constant 0 : index
    %70 = vector.load %arg10[%c4_65, %c0_66] : memref<40x128xf32, #tpu.memory_space<vmem>>, vector<1x128xf32>
    %c0_67 = arith.constant 0 : index
    %c0_68 = arith.constant 0 : index
    %71 = vector.load %arg11[%c0_67, %c0_68] : memref<8x128xf32, #tpu.memory_space<vmem>>, vector<1x128xf32>
    tpu.vector_store %arg11[%c0_67, %c0_68], %70 {strides = array<i32>} : memref<8x128xf32, #tpu.memory_space<vmem>>, vector<1x128xf32>,
    %c16_69 = arith.constant 16 : index
    %c0_70 = arith.constant 0 : index
    %72 = vector.load %arg10[%c16_69, %c0_70] : memref<40x128xf32, #tpu.memory_space<vmem>>, vector<1x128xf32>
    %c0_71 = arith.constant 0 : index
    %c0_72 = arith.constant 0 : index
    %73 = vector.load %arg12[%c0_71, %c0_72] : memref<8x128xf32, #tpu.memory_space<vmem>>, vector<1x128xf32>
    tpu.vector_store %arg12[%c0_71, %c0_72], %72 {strides = array<i32>} : memref<8x128xf32, #tpu.memory_space<vmem>>, vector<1x128xf32>,
    %c18 = arith.constant 18 : index
    %c0_73 = arith.constant 0 : index
    %74 = vector.load %arg10[%c18, %c0_73] : memref<40x128xf32, #tpu.memory_space<vmem>>, vector<1x128xf32>
    %c1_74 = arith.constant 1 : index
    %c0_75 = arith.constant 0 : index
    %75 = vector.load %arg11[%c1_74, %c0_75] : memref<8x128xf32, #tpu.memory_space<vmem>>, vector<1x128xf32>
    tpu.vector_store %arg11[%c1_74, %c0_75], %74 {strides = array<i32>} : memref<8x128xf32, #tpu.memory_space<vmem>>, vector<1x128xf32>,
    %c19 = arith.constant 19 : index
    %c0_76 = arith.constant 0 : index
    %76 = vector.load %arg10[%c19, %c0_76] : memref<40x128xf32, #tpu.memory_space<vmem>>, vector<1x128xf32>
    %c1_77 = arith.constant 1 : index
    %c0_78 = arith.constant 0 : index
    %77 = vector.load %arg12[%c1_77, %c0_78] : memref<8x128xf32, #tpu.memory_space<vmem>>, vector<1x128xf32>
    tpu.vector_store %arg12[%c1_77, %c0_78], %76 {strides = array<i32>} : memref<8x128xf32, #tpu.memory_space<vmem>>, vector<1x128xf32>,
    %c12 = arith.constant 12 : index
    %c0_79 = arith.constant 0 : index
    %78 = vector.load %arg10[%c12, %c0_79] : memref<40x128xf32, #tpu.memory_space<vmem>>, vector<1x128xf32>
    %c2_80 = arith.constant 2 : index
    %c0_81 = arith.constant 0 : index
    %79 = vector.load %arg11[%c2_80, %c0_81] : memref<8x128xf32, #tpu.memory_space<vmem>>, vector<1x128xf32>
    tpu.vector_store %arg11[%c2_80, %c0_81], %78 {strides = array<i32>} : memref<8x128xf32, #tpu.memory_space<vmem>>, vector<1x128xf32>,
    %c20 = arith.constant 20 : index
    %c0_82 = arith.constant 0 : index
    %80 = vector.load %arg10[%c20, %c0_82] : memref<40x128xf32, #tpu.memory_space<vmem>>, vector<1x128xf32>
    %c2_83 = arith.constant 2 : index
    %c0_84 = arith.constant 0 : index
    %81 = vector.load %arg12[%c2_83, %c0_84] : memref<8x128xf32, #tpu.memory_space<vmem>>, vector<1x128xf32>
    tpu.vector_store %arg12[%c2_83, %c0_84], %80 {strides = array<i32>} : memref<8x128xf32, #tpu.memory_space<vmem>>, vector<1x128xf32>,
    %c0_85 = arith.constant 0 : index
    %c0_86 = arith.constant 0 : index
    %82 = vector.load %arg11[%c0_85, %c0_86] : memref<8x128xf32, #tpu.memory_space<vmem>>, vector<8x128xf32>
    %83 = arith.truncf %82 : vector<8x128xf32> to vector<8x128xbf16>
    %c0_87 = arith.constant 0 : index
    %c0_88 = arith.constant 0 : index
    %84 = vector.load %arg12[%c0_87, %c0_88] : memref<8x128xf32, #tpu.memory_space<vmem>>, vector<8x128xf32>
    %85 = arith.truncf %84 : vector<8x128xf32> to vector<8x128xbf16>
    %cst_89 = arith.constant dense<0.000000e+00> : vector<8x256xf32>
    %86 = tpu.matmul %83, %6, %cst_89 {dimension_numbers = #tpu.dot_dimension_numbers<[1], [0], [0], [1], [0, 0, 1, 1], [], []>} : vector<8x128xbf16>, vector<128x256xbf16>, vector<8x256xf32> -> vector<8x256xf32>
    %cst_90 = arith.constant dense<0.000000e+00> : vector<8x256xf32>
    %87 = tpu.matmul %85, %7, %cst_90 {dimension_numbers = #tpu.dot_dimension_numbers<[1], [0], [0], [1], [0, 0, 1, 1], [], []>} : vector<8x128xbf16>, vector<128x256xbf16>, vector<8x256xf32> -> vector<8x256xf32>
    %88 = arith.addf %86, %87 : vector<8x256xf32>
    %89 = vector.broadcast %8 : vector<1x256xf32> to vector<8x256xf32>
    %90 = arith.addf %88, %89 : vector<8x256xf32>
    %91 = math.tanh %90 : vector<8x256xf32>
    %92 = arith.truncf %91 : vector<8x256xf32> to vector<8x256xbf16>
    %cst_91 = arith.constant dense<0.000000e+00> : vector<8x128xf32>
    %93 = tpu.matmul %92, %9, %cst_91 {dimension_numbers = #tpu.dot_dimension_numbers<[1], [0], [0], [1], [0, 0, 1, 1], [], []>} : vector<8x256xbf16>, vector<256x128xbf16>, vector<8x128xf32> -> vector<8x128xf32>
    %94 = vector.broadcast %10 : vector<1x128xf32> to vector<8x128xf32>
    %95 = arith.addf %93, %94 : vector<8x128xf32>
    %cst_92 = arith.constant dense<0.000000e+00> : vector<8xf32>
    %96 = vector.multi_reduction <add>, %95, %cst_92 [1] : vector<8x128xf32> to vector<8xf32>
    %97 = vector.shape_cast %96 : vector<8xf32> to vector<8x1xf32>
    %cst_93 = arith.constant 1.280000e+02 : f32
    %98 = vector.broadcast %cst_93 : f32 to vector<8x1xf32>
    %99 = arith.divf %97, %98 : vector<8x1xf32>
    %100 = vector.broadcast %99 : vector<8x1xf32> to vector<8x128xf32>
    %101 = arith.subf %95, %100 : vector<8x128xf32>
    %102 = arith.mulf %101, %101 : vector<8x128xf32>
    %cst_94 = arith.constant dense<0.000000e+00> : vector<8xf32>
    %103 = vector.multi_reduction <add>, %102, %cst_94 [1] : vector<8x128xf32> to vector<8xf32>
    %104 = vector.shape_cast %103 : vector<8xf32> to vector<8x1xf32>
    %cst_95 = arith.constant 1.280000e+02 : f32
    %105 = vector.broadcast %cst_95 : f32 to vector<8x1xf32>
    %106 = arith.divf %104, %105 : vector<8x1xf32>
    %107 = vector.broadcast %99 : vector<8x1xf32> to vector<8x128xf32>
    %108 = arith.subf %95, %107 : vector<8x128xf32>
    %cst_96 = arith.constant 9.99999974E-6 : f32
    %109 = vector.broadcast %cst_96 : f32 to vector<8x1xf32>
    %110 = arith.addf %106, %109 : vector<8x1xf32>
    %111 = math.rsqrt %110 : vector<8x1xf32>
    %112 = vector.broadcast %111 : vector<8x1xf32> to vector<8x128xf32>
    %113 = arith.mulf %108, %112 : vector<8x128xf32>
    %114 = vector.broadcast %11 : vector<1x128xf32> to vector<8x128xf32>
    %115 = arith.mulf %113, %114 : vector<8x128xf32>
    %116 = vector.broadcast %12 : vector<1x128xf32> to vector<8x128xf32>
    %117 = arith.addf %115, %116 : vector<8x128xf32>
    %c24 = arith.constant 24 : index
    %c0_97 = arith.constant 0 : index
    %118 = vector.load %arg10[%c24, %c0_97] : memref<40x128xf32, #tpu.memory_space<vmem>>, vector<8x128xf32>
    tpu.vector_store %arg10[%c24, %c0_97], %117 {strides = array<i32>} : memref<40x128xf32, #tpu.memory_space<vmem>>, vector<8x128xf32>,
    %c17 = arith.constant 17 : index
    %c0_98 = arith.constant 0 : index
    %119 = vector.load %arg10[%c17, %c0_98] : memref<40x128xf32, #tpu.memory_space<vmem>>, vector<1x128xf32>
    %c0_99 = arith.constant 0 : index
    %c0_100 = arith.constant 0 : index
    %120 = vector.load %arg11[%c0_99, %c0_100] : memref<8x128xf32, #tpu.memory_space<vmem>>, vector<1x128xf32>
    tpu.vector_store %arg11[%c0_99, %c0_100], %119 {strides = array<i32>} : memref<8x128xf32, #tpu.memory_space<vmem>>, vector<1x128xf32>,
    %c24_101 = arith.constant 24 : index
    %c0_102 = arith.constant 0 : index
    %121 = vector.load %arg10[%c24_101, %c0_102] : memref<40x128xf32, #tpu.memory_space<vmem>>, vector<1x128xf32>
    %c0_103 = arith.constant 0 : index
    %c0_104 = arith.constant 0 : index
    %122 = vector.load %arg12[%c0_103, %c0_104] : memref<8x128xf32, #tpu.memory_space<vmem>>, vector<1x128xf32>
    tpu.vector_store %arg12[%c0_103, %c0_104], %121 {strides = array<i32>} : memref<8x128xf32, #tpu.memory_space<vmem>>, vector<1x128xf32>,
    %c0_105 = arith.constant 0 : index
    %c0_106 = arith.constant 0 : index
    %123 = vector.load %arg11[%c0_105, %c0_106] : memref<8x128xf32, #tpu.memory_space<vmem>>, vector<8x128xf32>
    %124 = arith.truncf %123 : vector<8x128xf32> to vector<8x128xbf16>
    %c0_107 = arith.constant 0 : index
    %c0_108 = arith.constant 0 : index
    %125 = vector.load %arg12[%c0_107, %c0_108] : memref<8x128xf32, #tpu.memory_space<vmem>>, vector<8x128xf32>
    %126 = arith.truncf %125 : vector<8x128xf32> to vector<8x128xbf16>
    %cst_109 = arith.constant dense<0.000000e+00> : vector<8x256xf32>
    %127 = tpu.matmul %124, %6, %cst_109 {dimension_numbers = #tpu.dot_dimension_numbers<[1], [0], [0], [1], [0, 0, 1, 1], [], []>} : vector<8x128xbf16>, vector<128x256xbf16>, vector<8x256xf32> -> vector<8x256xf32>
    %cst_110 = arith.constant dense<0.000000e+00> : vector<8x256xf32>
    %128 = tpu.matmul %126, %7, %cst_110 {dimension_numbers = #tpu.dot_dimension_numbers<[1], [0], [0], [1], [0, 0, 1, 1], [], []>} : vector<8x128xbf16>, vector<128x256xbf16>, vector<8x256xf32> -> vector<8x256xf32>
    %129 = arith.addf %127, %128 : vector<8x256xf32>
    %130 = vector.broadcast %8 : vector<1x256xf32> to vector<8x256xf32>
    %131 = arith.addf %129, %130 : vector<8x256xf32>
    %132 = math.tanh %131 : vector<8x256xf32>
    %133 = arith.truncf %132 : vector<8x256xf32> to vector<8x256xbf16>
    %cst_111 = arith.constant dense<0.000000e+00> : vector<8x128xf32>
    %134 = tpu.matmul %133, %9, %cst_111 {dimension_numbers = #tpu.dot_dimension_numbers<[1], [0], [0], [1], [0, 0, 1, 1], [], []>} : vector<8x256xbf16>, vector<256x128xbf16>, vector<8x128xf32> -> vector<8x128xf32>
    %135 = vector.broadcast %10 : vector<1x128xf32> to vector<8x128xf32>
    %136 = arith.addf %134, %135 : vector<8x128xf32>
    %cst_112 = arith.constant dense<0.000000e+00> : vector<8xf32>
    %137 = vector.multi_reduction <add>, %136, %cst_112 [1] : vector<8x128xf32> to vector<8xf32>
    %138 = vector.shape_cast %137 : vector<8xf32> to vector<8x1xf32>
    %cst_113 = arith.constant 1.280000e+02 : f32
    %139 = vector.broadcast %cst_113 : f32 to vector<8x1xf32>
    %140 = arith.divf %138, %139 : vector<8x1xf32>
    %141 = vector.broadcast %140 : vector<8x1xf32> to vector<8x128xf32>
    %142 = arith.subf %136, %141 : vector<8x128xf32>
    %143 = arith.mulf %142, %142 : vector<8x128xf32>
    %cst_114 = arith.constant dense<0.000000e+00> : vector<8xf32>
    %144 = vector.multi_reduction <add>, %143, %cst_114 [1] : vector<8x128xf32> to vector<8xf32>
    %145 = vector.shape_cast %144 : vector<8xf32> to vector<8x1xf32>
    %cst_115 = arith.constant 1.280000e+02 : f32
    %146 = vector.broadcast %cst_115 : f32 to vector<8x1xf32>
    %147 = arith.divf %145, %146 : vector<8x1xf32>
    %148 = vector.broadcast %140 : vector<8x1xf32> to vector<8x128xf32>
    %149 = arith.subf %136, %148 : vector<8x128xf32>
    %cst_116 = arith.constant 9.99999974E-6 : f32
    %150 = vector.broadcast %cst_116 : f32 to vector<8x1xf32>
    %151 = arith.addf %147, %150 : vector<8x1xf32>
    %152 = math.rsqrt %151 : vector<8x1xf32>
    %153 = vector.broadcast %152 : vector<8x1xf32> to vector<8x128xf32>
    %154 = arith.mulf %149, %153 : vector<8x128xf32>
    %155 = vector.broadcast %11 : vector<1x128xf32> to vector<8x128xf32>
    %156 = arith.mulf %154, %155 : vector<8x128xf32>
    %157 = vector.broadcast %12 : vector<1x128xf32> to vector<8x128xf32>
    %158 = arith.addf %156, %157 : vector<8x128xf32>
    %c32 = arith.constant 32 : index
    %c0_117 = arith.constant 0 : index
    %159 = vector.load %arg10[%c32, %c0_117] : memref<40x128xf32, #tpu.memory_space<vmem>>, vector<8x128xf32>
    tpu.vector_store %arg10[%c32, %c0_117], %158 {strides = array<i32>} : memref<40x128xf32, #tpu.memory_space<vmem>>, vector<8x128xf32>,
    %c32_118 = arith.constant 32 : index
    %c0_119 = arith.constant 0 : index
    %160 = vector.load %arg10[%c32_118, %c0_119] : memref<40x128xf32, #tpu.memory_space<vmem>>, vector<1x128xf32>
    %c0_120 = arith.constant 0 : index
    %c0_121 = arith.constant 0 : index
    %161 = vector.load %arg9[%c0_120, %c0_121] : memref<4x128xf32, #tpu.memory_space<vmem>>, vector<1x128xf32>
    tpu.vector_store %arg9[%c0_120, %c0_121], %160 {strides = array<i32>} : memref<4x128xf32, #tpu.memory_space<vmem>>, vector<1x128xf32>,
    %c5 = arith.constant 5 : index
    %c0_122 = arith.constant 0 : index
    %162 = vector.load %arg10[%c5, %c0_122] : memref<40x128xf32, #tpu.memory_space<vmem>>, vector<1x128xf32>
    %c1_123 = arith.constant 1 : index
    %c0_124 = arith.constant 0 : index
    %163 = vector.load %arg9[%c1_123, %c0_124] : memref<4x128xf32, #tpu.memory_space<vmem>>, vector<1x128xf32>
    tpu.vector_store %arg9[%c1_123, %c0_124], %162 {strides = array<i32>} : memref<4x128xf32, #tpu.memory_space<vmem>>, vector<1x128xf32>,
    %c25 = arith.constant 25 : index
    %c0_125 = arith.constant 0 : index
    %164 = vector.load %arg10[%c25, %c0_125] : memref<40x128xf32, #tpu.memory_space<vmem>>, vector<1x128xf32>
    %c2_126 = arith.constant 2 : index
    %c0_127 = arith.constant 0 : index
    %165 = vector.load %arg9[%c2_126, %c0_127] : memref<4x128xf32, #tpu.memory_space<vmem>>, vector<1x128xf32>
    tpu.vector_store %arg9[%c2_126, %c0_127], %164 {strides = array<i32>} : memref<4x128xf32, #tpu.memory_space<vmem>>, vector<1x128xf32>,
    %c26 = arith.constant 26 : index
    %c0_128 = arith.constant 0 : index
    %166 = vector.load %arg10[%c26, %c0_128] : memref<40x128xf32, #tpu.memory_space<vmem>>, vector<1x128xf32>
    %c3_129 = arith.constant 3 : index
    %c0_130 = arith.constant 0 : index
    %167 = vector.load %arg9[%c3_129, %c0_130] : memref<4x128xf32, #tpu.memory_space<vmem>>, vector<1x128xf32>
    tpu.vector_store %arg9[%c3_129, %c0_130], %166 {strides = array<i32>} : memref<4x128xf32, #tpu.memory_space<vmem>>, vector<1x128xf32>,
    return
  }
  func.func @transform_0(%arg0: i32) -> (i32, i32) {
    %c0_i32 = arith.constant 0 : i32
    %c0_i32_0 = arith.constant 0 : i32
    %c0_i32_1 = arith.constant 0 : i32
    return %c0_i32, %c0_i32_0 : i32, i32
  }
  func.func @transform_1(%arg0: i32) -> (i32, i32) {
    %c0_i32 = arith.constant 0 : i32
    %c0_i32_0 = arith.constant 0 : i32
    %c0_i32_1 = arith.constant 0 : i32
    return %c0_i32, %c0_i32_0 : i32, i32
  }
  func.func @transform_2(%arg0: i32) -> (i32, i32) {
    %c0_i32 = arith.constant 0 : i32
    %c0_i32_0 = arith.constant 0 : i32
    %c0_i32_1 = arith.constant 0 : i32
    return %c0_i32, %c0_i32_0 : i32, i32
  }
  func.func @transform_3(%arg0: i32) -> (i32, i32) {
    %c0_i32 = arith.constant 0 : i32
    %c0_i32_0 = arith.constant 0 : i32
    %c0_i32_1 = arith.constant 0 : i32
    return %c0_i32, %c0_i32_0 : i32, i32
  }
  func.func @transform_4(%arg0: i32) -> (i32, i32) {
    %c0_i32 = arith.constant 0 : i32
    %c0_i32_0 = arith.constant 0 : i32
    %c0_i32_1 = arith.constant 0 : i32
    return %c0_i32, %c0_i32_0 : i32, i32
  }
  func.func @transform_5(%arg0: i32) -> (i32, i32) {
    %c0_i32 = arith.constant 0 : i32
    %c0_i32_0 = arith.constant 0 : i32
    %c0_i32_1 = arith.constant 0 : i32
    return %c0_i32, %c0_i32_0 : i32, i32
  }
  func.func @transform_6(%arg0: i32) -> (i32, i32) {
    %c0_i32 = arith.constant 0 : i32
    %c0_i32_0 = arith.constant 0 : i32
    %c0_i32_1 = arith.constant 0 : i32
    return %c0_i32, %c0_i32_0 : i32, i32
  }
  func.func @transform_7(%arg0: i32) -> (i32, i32) {
    %c0_i32 = arith.constant 0 : i32
    %c0_i32_0 = arith.constant 0 : i32
    %c0_i32_1 = arith.constant 0 : i32
    return %c0_i32, %c0_i32_0 : i32, i32
  }
  func.func @transform_8(%arg0: i32) -> (i32, i32) {
    %c0_i32 = arith.constant 0 : i32
    %c0_i32_0 = arith.constant 0 : i32
    %c0_i32_1 = arith.constant 0 : i32
    return %c0_i32, %c0_i32_0 : i32, i32
  }
}

</mosaic_0001>

<bundles_post_ra>
// kernel: tpu_custom_call.1
= control target key start
LH: loop header
LB: loop body
LE: loop exit
PB: predicated region body
PF: predicated region fallthrough
CT: control target
= control target key end

     0   :  { %13 = vsyncpa [#allocation6], 0  ;;  %s1695_s0 = inlined_call_operand.hbm [shape: f32[16,128], index: 0, kind: input, shape index: {}]   ;;  %s1696_s1 = inlined_call_operand.hbm [shape: bf16[128,256], index: 1, kind: input, shape index: {}]   ;;  %s1697_s2 = inlined_call_operand.hbm [shape: bf16[128,256], index: 2, kind: input, shape index: {}]   ;;  %s1698_s3 = inlined_call_operand.vmem [shape: f32[1,256], index: 3, kind: input, shape index: {}]   ;;  %s1699_s4 = inlined_call_operand.hbm [shape: bf16[256,128], index: 4, kind: input, shape index: {}]   ;;  %s1700_s5 = inlined_call_operand.vmem [shape: f32[1,128], index: 5, kind: input, shape index: {}]   ;;  %s1701_s6 = inlined_call_operand.vmem [shape: f32[1,128], index: 6, kind: input, shape index: {}]   ;;  %s1702_s7 = inlined_call_operand.vmem [shape: f32[1,128], index: 7, kind: input, shape index: {}]   ;;  %s1703_s8 = inlined_call_operand.hbm [shape: f32[4,128], index: 8, kind: output, shape index: {}]  }
   0x1   :  { %14 = vsyncpa [#allocation9], 0 }
   0x2   :  { %15 = vsyncpa [#allocation12], 0 }
   0x3   :  { %16 = vsyncpa [#allocation7], 0  ;;  %s1273_s27 = smov [#allocation8]   ;;  %s1274_s29 = smov [#allocation5]  }
   0x4   :  { %s34_s28 = sshll.u32 %s1273_s27, 4  ;;  %s22_s30 = sshll.u32 %s1274_s29, 4  ;;  %s35_s28 = int_to_ptr.vmem [resolvable:$true] %s34_s28  ;;  %s1329_s30 = int_to_ptr.vmem [resolvable:$true] %s22_s30 }
   0x5   :  { %s1155_s11 = scalar_lea.hbm %s1696_s1, 2048 }
   0x6   :  { %p1156_p0 = scmp.ne.s32.totalorder %s1696_s1, %s1155_s11  ;;  %p1159_p1 = scmp.lt.u32.totalorder %s1155_s11, %s1696_s1 }
   0x8   :  { %p1161_p2 = pnand %p1159_p1, %p1156_p0 }
   0xa   :  { %1164 = shalt.err (!%p1161_p2)
}
   0xb   :  { %s1165_s16 = scalar_lea.vmem %s35_s28, 2048  ;;  %p1170_p4 = scmp.lt.s32.totalorder %s35_s28, %s35_s28 }
   0xc   :  { %p1166_p3 = scmp.ne.s32.totalorder %s35_s28, %s1165_s16  ;;  %p1171_p5 = scmp.lt.s32.totalorder %s1165_s16, %s1165_s16 }
   0xe   :  { %p1172_p6 = por %p1171_p5, %p1170_p4 }
  0x10   :  { %p1173_p7 = pnand %p1172_p6, %p1166_p3 }
  0x12   :  { %1176 = shalt.err (!%p1173_p7)
}
  0x13   :  { %s1275_s17 = smov 128   ;;  %s1276_s18 = smov 8  }
  0x14   :  { %40 = dma.hbm_to_vmem [thread:$0]  %s1696_s1, 2048, %s35_s28, [#allocation9], %s1275_s17, %s1275_s17, %s1276_s18  }
  0x15   :  { %s1177_s23 = scalar_lea.hbm %s1695_s0, 256 }
  0x16   :  { %p1178_p8 = scmp.ne.s32.totalorder %s1695_s0, %s1177_s23  ;;  %p1181_p9 = scmp.lt.u32.totalorder %s1177_s23, %s1695_s0 }
  0x18   :  { %p1183_p10 = pnand %p1181_p9, %p1178_p8 }
  0x1a   :  { %1186 = shalt.err (!%p1183_p10)
}
  0x1b   :  { %s1187_s29 = scalar_lea.vmem %s1329_s30, 256  ;;  %p1192_p12 = scmp.lt.s32.totalorder %s1329_s30, %s1329_s30 }
  0x1c   :  { %p1188_p11 = scmp.ne.s32.totalorder %s1329_s30, %s1187_s29  ;;  %p1193_p13 = scmp.lt.s32.totalorder %s1187_s29, %s1187_s29 }
  0x1e   :  { %p1194_p0 = por %p1193_p13, %p1192_p12 }
  0x20   :  { %p1195_p1 = pnand %p1194_p0, %p1188_p11 }
  0x22   :  { %1198 = shalt.err (!%p1195_p1)
}
  0x23   :  { %28 = dma.hbm_to_vmem [thread:$0]  %s1695_s0, 256, %s1329_s30, [#allocation6], %s1275_s17, %s1275_s17, %s1276_s18  }
  0x24   :  { %s1277_s9 = smov [#allocation10]   ;;  %s1278_s11 = smov [#allocation11]  }
  0x25   :  { %s46_s10 = sshll.u32 %s1277_s9, 4  ;;  %s60_s12 = sshll.u32 %s1278_s11, 4  ;;  %s47_s10 = int_to_ptr.vmem [resolvable:$true] %s46_s10  ;;  %s1366_s12 = int_to_ptr.vmem [resolvable:$true] %s60_s12 }
  0x26   :  { %s1199_s15 = scalar_lea.hbm %s1697_s2, 2048 }
  0x27   :  { %p1200_p2 = scmp.ne.s32.totalorder %s1697_s2, %s1199_s15  ;;  %p1203_p3 = scmp.lt.u32.totalorder %s1199_s15, %s1697_s2 }
  0x29   :  { %p1205_p4 = pnand %p1203_p3, %p1200_p2 }
  0x2b   :  { %1208 = shalt.err (!%p1205_p4)
}
  0x2c   :  { %s1209_s0 = scalar_lea.vmem %s47_s10, 2048  ;;  %p1214_p6 = scmp.lt.s32.totalorder %s47_s10, %s47_s10 }
  0x2d   :  { %p1210_p5 = scmp.ne.s32.totalorder %s47_s10, %s1209_s0  ;;  %p1215_p7 = scmp.lt.s32.totalorder %s1209_s0, %s1209_s0 }
  0x2f   :  { %p1216_p8 = por %p1215_p7, %p1214_p6 }
  0x31   :  { %p1217_p9 = pnand %p1216_p8, %p1210_p5 }
  0x33   :  { %1220 = shalt.err (!%p1217_p9)
}
  0x34   :  { %52 = dma.hbm_to_vmem [thread:$0]  %s1697_s2, 2048, %s47_s10, [#allocation9], %s1275_s17, %s1275_s17, %s1276_s18  }
  0x35   :  { %s1221_s25 = scalar_lea.hbm %s1699_s4, 2048 }
  0x36   :  { %p1222_p10 = scmp.ne.s32.totalorder %s1699_s4, %s1221_s25  ;;  %p1225_p11 = scmp.lt.u32.totalorder %s1221_s25, %s1699_s4 }
  0x38   :  { %p1227_p12 = pnand %p1225_p11, %p1222_p10 }
  0x3a   :  { %1230 = shalt.err (!%p1227_p12)
}
  0x3b   :  { %s1231_s28 = scalar_lea.vmem %s1366_s12, 2048  ;;  %p1236_p0 = scmp.lt.s32.totalorder %s1366_s12, %s1366_s12 }
  0x3c   :  { %p1232_p13 = scmp.ne.s32.totalorder %s1366_s12, %s1231_s28  ;;  %p1237_p1 = scmp.lt.s32.totalorder %s1231_s28, %s1231_s28 }
  0x3e   :  { %p1238_p2 = por %p1237_p1, %p1236_p0 }
  0x40   :  { %p1239_p3 = pnand %p1238_p2, %p1232_p13 }
  0x42   :  { %1242 = shalt.err (!%p1239_p3)
}
  0x43   :  { %s1279_s2 = smov 64   ;;  %s1280_s17 = smov 4  }
  0x44   :  { %66 = dma.hbm_to_vmem [thread:$0]  %s1699_s4, 2048, %s1366_s12, [#allocation12], %s1279_s2, %s1279_s2, %s1280_s17  }
  0x45   :  { %1265 = dma.done.wait [#allocation6], 256  }
  0x46   :  { %1266 = vsyncadd [#allocation6], 4294967040 }
  0x47   :  { %1267 = dma.done.wait [#allocation9], 4096  }
  0x48   :  { %1268 = vsyncadd [#allocation9], 4294963200 }
  0x49   :  { %1269 = dma.done.wait [#allocation12], 2048  }
  0x4a   :  { %1270 = vsyncadd [#allocation12], 4294965248  ;;  %v1704_v0 = vmov 0   ;;  %v1282_v1 = vmov 0.0   ;;  %v1402_v2 = vld [vmem:[#allocation10 + $0x4] ss:$8 sps:$4 sm:$0xff]  }
  0x4b   :  { %296 = vmatprep.mubr.bf16.mxu0 %v1704_v0  ;;  %417 = vmatprep.mubr.bf16.mxu1 %v1704_v0  ;;  %91 = vst [vmem:[#allocation4] sm:$0xff] %v1282_v1  ;;  %90 = vst [vmem:[#allocation3] sm:$0xff] %v1282_v1  ;;  %v1404_v3 = vld [vmem:[#allocation8 + $0x4] ss:$8 sps:$4 sm:$0xff]   ;;  %v1407_v4 = vld [vmem:[#allocation10] ss:$8 sps:$4 sm:$0xff]  }
  0x4c   :  { %1711 = vst [vmem:[#allocation18_spill] sm:$0xff] %v1404_v3  ;;  %264 = vmatprep.subr.bf16.mxu0 %v1402_v2  ;;  %v1409_v5 = vld [vmem:[#allocation8] ss:$8 sps:$4 sm:$0xff]   ;;  %385 = vmatprep.subr.bf16.mxu1 %v1404_v3  ;;  %v1412_v6 = vld [vmem:[#allocation10 + $0x14] ss:$8 sps:$4 sm:$0xff]  }
  0x4d   :  { %265 = vmatpush1.bf16.msra.mxu0 %v1407_v4  ;;  %386 = vmatpush1.bf16.msra.mxu1 %v1409_v5  ;;  %v1416_v7 = vld [vmem:[#allocation8 + $0x14] ss:$8 sps:$4 sm:$0xff]   ;;  %v1418_v8 = vld [vmem:[#allocation10 + $0x10] ss:$8 sps:$4 sm:$0xff]   ;;  %v1424_v10 = vld [vmem:[#allocation10 + $0x24] ss:$8 sps:$4 sm:$0xff]  }
  0x4e   :  { %266 = vmatprep.subr.bf16.mxu0 %v1412_v6  ;;  %v1421_v9 = vld [vmem:[#allocation8 + $0x10] ss:$8 sps:$4 sm:$0xff]   ;;  %387 = vmatprep.subr.bf16.mxu1 %v1416_v7  ;;  %v1426_v11 = vld [vmem:[#allocation8 + $0x24] ss:$8 sps:$4 sm:$0xff]   ;;  %v1428_v12 = vld [vmem:[#allocation10 + $0x20] ss:$8 sps:$4 sm:$0xff]  }
  0x4f   :  { %v1430_v13 = vld [vmem:[#allocation8 + $0x20] ss:$8 sps:$4 sm:$0xff]   ;;  %v1434_v14 = vld [vmem:[#allocation10 + $0x34] ss:$8 sps:$4 sm:$0xff]   ;;  %v1440_v16 = vld [vmem:[#allocation10 + $0x30] ss:$8 sps:$4 sm:$0xff]  }
  0x50   :  { %v1438_v15 = vld [vmem:[#allocation8 + $0x34] ss:$8 sps:$4 sm:$0xff]   ;;  %v1444_v17 = vld [vmem:[#allocation8 + $0x30] ss:$8 sps:$4 sm:$0xff]   ;;  %v1446_v18 = vld [vmem:[#allocation10 + $0x44] ss:$8 sps:$4 sm:$0xff]  }
  0x51   :  { %267 = vmatpush1.bf16.msra.mxu0 %v1418_v8  ;;  %388 = vmatpush1.bf16.msra.mxu1 %v1421_v9  ;;  %v1450_v19 = vld [vmem:[#allocation8 + $0x44] ss:$8 sps:$4 sm:$0xff]   ;;  %v1452_v20 = vld [vmem:[#allocation10 + $0x40] ss:$8 sps:$4 sm:$0xff]   ;;  %v1458_v22 = vld [vmem:[#allocation10 + $0x54] ss:$8 sps:$4 sm:$0xff]  }
  0x52   :  { %268 = vmatprep.subr.bf16.mxu0 %v1424_v10  ;;  %389 = vmatprep.subr.bf16.mxu1 %v1426_v11  ;;  %v1454_v21 = vld [vmem:[#allocation8 + $0x40] ss:$8 sps:$4 sm:$0xff]   ;;  %v1462_v23 = vld [vmem:[#allocation8 + $0x54] ss:$8 sps:$4 sm:$0xff]   ;;  %v1464_v24 = vld [vmem:[#allocation10 + $0x50] ss:$8 sps:$4 sm:$0xff]  }
  0x53   :  { %v1468_v25 = vld [vmem:[#allocation8 + $0x50] ss:$8 sps:$4 sm:$0xff]   ;;  %v1470_v26 = vld [vmem:[#allocation10 + $0x64] ss:$8 sps:$4 sm:$0xff]   ;;  %v1476_v30 = vld [vmem:[#allocation10 + $0x60] ss:$8 sps:$4 sm:$0xff]  }
  0x54   :  { %v1474_v27 = vld [vmem:[#allocation8 + $0x64] ss:$8 sps:$4 sm:$0xff]   ;;  %v86_v28 = vld [vmem:[#allocation5] sm:$0xff]  ;;  %v87_v29 = vld [vmem:[#allocation5 + $0x8] sm:$0xff] }
  0x55   :  { %269 = vmatpush1.bf16.msra.mxu0 %v1428_v12  ;;  %390 = vmatpush1.bf16.msra.mxu1 %v1430_v13  ;;  %88 = vst [vmem:[#allocation2] sm:$0xff] %v86_v28  ;;  %89 = vst [vmem:[#allocation2 + $0x8] sm:$0xff] %v87_v29  ;;  %v1478_v31 = vld [vmem:[#allocation8 + $0x60] ss:$8 sps:$4 sm:$0xff]   ;;  %v1482_v32 = vld [vmem:[#allocation10 + $0x74] ss:$8 sps:$4 sm:$0xff]  }
  0x56   :  { %270 = vmatprep.subr.bf16.mxu0 %v1434_v14  ;;  %391 = vmatprep.subr.bf16.mxu1 %v1438_v15  ;;  %v1486_v33 = vld [vmem:[#allocation8 + $0x74] ss:$8 sps:$4 sm:$0xff]   ;;  %v1488_v34 = vld [vmem:[#allocation10 + $0x70] ss:$8 sps:$4 sm:$0xff]   ;;  %v1492_v36 = vld [vmem:[#allocation11 + $0x40] sm:$0xff]  }
  0x57   :  { %1712 = vst [vmem:[#allocation19_spill] sm:$0xff] %v1488_v34  ;;  %v1490_v35 = vld [vmem:[#allocation8 + $0x70] ss:$8 sps:$4 sm:$0xff]   ;;  %1713 = vst [vmem:[#allocation20_spill] sm:$0xff] %v1492_v36  ;;  %v1502_v49 = vld [vmem:[#allocation11] sm:$0xff]  }
  0x58   :  { %v1504_v52 = vld [vmem:[#allocation11 + $0x48] sm:$0xff]   ;;  %v1510_v56 = vld [vmem:[#allocation11 + $0x50] sm:$0xff]   ;;  %v1534_v58 = vld [vmem:[#allocation11 + $0x58] sm:$0xff]  }
  0x59   :  { %271 = vmatpush1.bf16.msra.mxu0 %v1440_v16  ;;  %392 = vmatpush1.bf16.msra.mxu1 %v1444_v17  ;;  %v1507_v55 = vld [vmem:[#allocation11 + $0x8] sm:$0xff]   ;;  %v1516_v57 = vld [vmem:[#allocation11 + $0x10] sm:$0xff]   ;;  %v1536_v59 = vld [vmem:[#allocation11 + $0x18] sm:$0xff]  }
  0x5a   :  { %272 = vmatprep.subr.bf16.mxu0 %v1446_v18  ;;  %393 = vmatprep.subr.bf16.mxu1 %v1450_v19  ;;  %v1540_v60 = vld [vmem:[#allocation11 + $0x60] sm:$0xff]   ;;  %v1546_v62 = vld [vmem:[#allocation11 + $0x68] sm:$0xff]   ;;  %v1552_v1 = vld [vmem:[#allocation11 + $0x70] sm:$0xff]  }
  0x5b   :  { %v1542_v61 = vld [vmem:[#allocation11 + $0x20] sm:$0xff]   ;;  %v1548_v63 = vld [vmem:[#allocation11 + $0x28] sm:$0xff]   ;;  %v1554_v28 = vld [vmem:[#allocation11 + $0x30] sm:$0xff]  }
  0x5c   :  { %v162_v37 = vld [vmem:[#allocation2 + $0x1] sm:$0x1]  ;;  %v166_v38 = vld [vmem:[#allocation2 + $0x3] sm:$0x1]  ;;  %v170_v39 = vld [vmem:[#allocation2 + $0x7] sm:$0x1] }
  0x5d   :  { %273 = vmatpush1.bf16.msra.mxu0 %v1452_v20  ;;  %394 = vmatpush1.bf16.msra.mxu1 %v1454_v21  ;;  %163 = vst [vmem:[#allocation4] sm:$0x1] %v162_v37  ;;  %167 = vst [vmem:[#allocation4 + $0x1] sm:$0x1] %v166_v38  ;;  %v174_v40 = vld [vmem:[#allocation2 + $0x9] sm:$0x1]  ;;  %v427_v38 = vlaneseq }
  0x5e   :  { %274 = vmatprep.subr.bf16.mxu0 %v1458_v22  ;;  %395 = vmatprep.subr.bf16.mxu1 %v1462_v23  ;;  %171 = vst [vmem:[#allocation4 + $0x2] sm:$0x1] %v170_v39  ;;  %v178_v41 = vld [vmem:[#allocation2 + $0xb] sm:$0x1]  ;;  %v160_v42 = vld [vmem:[#allocation2] sm:$0x1] }
  0x5f   :  { %175 = vst [vmem:[#allocation4 + $0x3] sm:$0x1] %v174_v40  ;;  %179 = vst [vmem:[#allocation4 + $0x4] sm:$0x1] %v178_v41  ;;  %v164_v43 = vld [vmem:[#allocation2 + $0x2] sm:$0x1] }
  0x60   :  { %161 = vst [vmem:[#allocation3] sm:$0x1] %v160_v42  ;;  %v168_v44 = vld [vmem:[#allocation2 + $0x6] sm:$0x1]  ;;  %v172_v45 = vld [vmem:[#allocation2 + $0x8] sm:$0x1] }
  0x61   :  { %275 = vmatpush1.bf16.msra.mxu0 %v1464_v24  ;;  %396 = vmatpush1.bf16.msra.mxu1 %v1468_v25  ;;  %165 = vst [vmem:[#allocation3 + $0x1] sm:$0x1] %v164_v43  ;;  %169 = vst [vmem:[#allocation3 + $0x2] sm:$0x1] %v168_v44  ;;  %v176_v46 = vld [vmem:[#allocation2 + $0xa] sm:$0x1] }
  0x62   :  { %276 = vmatprep.subr.bf16.mxu0 %v1470_v26  ;;  %397 = vmatprep.subr.bf16.mxu1 %v1474_v27  ;;  %173 = vst [vmem:[#allocation3 + $0x3] sm:$0x1] %v172_v45  ;;  %177 = vst [vmem:[#allocation3 + $0x4] sm:$0x1] %v176_v46  ;;  %v612_v47 = vld [vmem:[#allocation2 + $0x4] sm:$0x1] }
  0x63   :  { %v620_v48 = vld [vmem:[#allocation2 + $0xc] sm:$0x1]  ;;  %v1558_v29 = vld [vmem:[#allocation11 + $0x78] sm:$0xff]   ;;  %v428_v39 = vshrl.u32 %v427_v38, 7 }
  0x64   :  { %v1560_v37 = vld [vmem:[#allocation11 + $0x38] sm:$0xff]  }
  0x65   :  { %277 = vmatpush1.bf16.msra.mxu0 %v1476_v30  ;;  %398 = vmatpush1.bf16.msra.mxu1 %v1478_v31  ;;  %1714 = vst [vmem:[#allocation21_spill] sm:$0xff] %v1560_v37  ;;  %v429_v40 = vsub.s32 0, %v428_v39  ;;  %v124_v41 = vld [vmem:[%s1698_s3] sm:$0x3]  ;;  %v433_v42 = vsub.s32 1, %v428_v39 }
  0x66   :  { %278 = vmatprep.subr.bf16.mxu0 %v1482_v32  ;;  %399 = vmatprep.subr.bf16.mxu1 %v1486_v33  ;;  %v182_v50 = vld [vmem:[#allocation4] sm:$0xff] }
  0x67   :  { %v183_v51 = vpack.c.bf16 %v182_v50, %v182_v50  ;;  %v1568_v44 = vrot.slane %v124_v41, %v429_v40 }
  0x69   :  { %279 = vmatpush1.bf16.msra.mxu0 %v1488_v34  ;;  %400 = vmatpush1.bf16.msra.mxu1 %v1490_v35  ;;  %v180_v53 = vld [vmem:[#allocation3] sm:$0xff] }
  0x6a   :  { %996 = vmatprep.subr.bf16.mxu0 %v1492_v36  ;;  %628 = vmatprep.subr.bf16.mxu1 %v1402_v2  ;;  %v181_v54 = vpack.c.bf16 %v180_v53, %v180_v53  ;;  %613 = vst [vmem:[#allocation3] sm:$0x1] %v612_v47  ;;  %621 = vst [vmem:[#allocation3 + $0x2] sm:$0x1] %v620_v48  ;;  %v1570_v47 = vrot.slane %v124_v41, %v433_v42  ;;  %v1715_v41 = vmov 0  }
  0x6c   :  { %297 = vmatmul.mubr.bf16.vlgmr.msra.gmra.mrb[0].mxu0 %v183_v51  ;;  %418 = vmatmul.mubr.bf16.vlgmr.msra.gmra.mrb[0].mxu1 %v181_v54 }
  0x6d   :  { %997 = vmatpush3.bf16.msra.mxu0 %v1502_v49  ;;  %629 = vmatpush1.bf16.msra.mxu1 %v1407_v4 }
  0x6e   :  { %998 = vmatprep.subr.bf16.mxu0 %v1504_v52  ;;  %660 = vmatprep.mubr.bf16.mxu1 %v1704_v0 }
  0x6f   :  { %630 = vmatprep.subr.bf16.mxu1 %v1412_v6 }
  0x71   :  { %999 = vmatpush3.bf16.msra.mxu0 %v1507_v55  ;;  %631 = vmatpush1.bf16.msra.mxu1 %v1418_v8 }
  0x72   :  { %1000 = vmatprep.subr.bf16.mxu0 %v1510_v56  ;;  %632 = vmatprep.subr.bf16.mxu1 %v1424_v10 }
  0x75   :  { %1001 = vmatpush3.bf16.msra.mxu0 %v1516_v57  ;;  %633 = vmatpush1.bf16.msra.mxu1 %v1428_v12 }
  0x76   :  { %634 = vmatprep.subr.bf16.mxu1 %v1434_v14  ;;  %1002 = vmatprep.subr.bf16.mxu0 %v1534_v58 }
  0x79   :  { %635 = vmatpush1.bf16.msra.mxu1 %v1440_v16  ;;  %1003 = vmatpush3.bf16.msra.mxu0 %v1536_v59 }
  0x7a   :  { %636 = vmatprep.subr.bf16.mxu1 %v1446_v18  ;;  %1004 = vmatprep.subr.bf16.mxu0 %v1540_v60 }
  0x7d   :  { %637 = vmatpush1.bf16.msra.mxu1 %v1452_v20  ;;  %1005 = vmatpush3.bf16.msra.mxu0 %v1542_v61 }
  0x7e   :  { %638 = vmatprep.subr.bf16.mxu1 %v1458_v22  ;;  %1006 = vmatprep.subr.bf16.mxu0 %v1546_v62 }
  0x81   :  { %639 = vmatpush1.bf16.msra.mxu1 %v1464_v24  ;;  %1007 = vmatpush3.bf16.msra.mxu0 %v1548_v63 }
  0x82   :  { %640 = vmatprep.subr.bf16.mxu1 %v1470_v26  ;;  %1008 = vmatprep.subr.bf16.mxu0 %v1552_v1 }
  0x85   :  { %641 = vmatpush1.bf16.msra.mxu1 %v1476_v30  ;;  %1009 = vmatpush3.bf16.msra.mxu0 %v1554_v28 }
  0x86   :  { %642 = vmatprep.subr.bf16.mxu1 %v1482_v32  ;;  %1010 = vmatprep.subr.bf16.mxu0 %v1558_v29 }
  0x89   :  { %643 = vmatpush1.bf16.msra.mxu1 %v1488_v34  ;;  %1011 = vmatpush3.bf16.msra.mxu0 %v1560_v37 }
  0x8a   :  { %1018 = vmatprep.subr.bf16.mxu1 %v1492_v36  ;;  %669 = vmatprep.subr.bf16.mxu0 %v1404_v3 }
 0x13f   :  { %v298_v43 = vpop.f32.mrb[0].mxu0  ;;  %v419_v46 = vpop.f32.mrb[0].mxu1 }
 0x140   :  { %v300_v45 = vpop.f32.mrb[1].mxu0  ;;  %v420_v50 = vadd.f32 %v419_v46, %v298_v43  ;;  %v421_v51 = vpop.f32.mrb[1].mxu1 }
 0x141   :  { %v302_v48 = vpop.f32.mrb[2].mxu0  ;;  %v422_v54 = vadd.f32 %v421_v51, %v300_v45  ;;  %v423_v0 = vpop.f32.mrb[2].mxu1 }
 0x142   :  { %v303_v53 = vpop.f32.mrb[3].mxu0  ;;  %v437_v38 = vadd.f32 %v1568_v44, %v420_v50  ;;  %v424_v36 = vpop.f32.mrb[3].mxu1 }
 0x143   :  { %v438_v3 = vadd.f32 %v1570_v47, %v422_v54 }
 0x144   :  { %1137 = vtanh.f32 %v437_v38  ;;  %v1600_v38 = vld [vmem:[%s1701_s6] ss:$0 sm:$0xff]  ;;  %s1283_s6 = smov [#allocation13]  }
 0x145   :  { %1139 = vtanh.f32 %v438_v3 }
 0x14e   :  { %v1138_v39 = vpop.eup %1137 }
 0x14f   :  { %v1140_v40 = vpop.eup %1139  ;;  %v441_v37 = vpack.c.bf16 %v1138_v39, %v1138_v39 }
 0x150   :  { %v442_v34 = vpack.c.bf16 %v1140_v40, %v1140_v40  ;;  %v1605_v40 = vld [vmem:[%s1702_s7] ss:$0 sm:$0xff]  ;;  %s934_s7 = sshll.u32 %s1283_s6, 4  ;;  %s935_s7 = int_to_ptr.vmem [resolvable:$true] %s934_s7 }
 0x151   :  { %s1243_s15 = scalar_lea.vmem %s935_s7, 64  ;;  %p1248_p5 = scmp.lt.s32.totalorder %s935_s7, %s935_s7 }
 0x152   :  { %577 = vmatprep.mubr.bf16.mxu0 %v442_v34  ;;  %v1594_v34 = vld [vmem:[%s1700_s5] ss:$0 sm:$0xff]  ;;  %p1244_p4 = scmp.ne.s32.totalorder %s935_s7, %s1243_s15  ;;  %p1249_p6 = scmp.lt.s32.totalorder %s1243_s15, %s1243_s15 }
 0x153   :  { %578 = vmatmul.mubr.bf16.vlgmr.msra.gmra.mrb[4].mxu0 %v441_v37 }
 0x154   :  { %670 = vmatpush1.bf16.msra.mxu0 %v1409_v5  ;;  %701 = vmatprep.mubr.bf16.mxu0 %v1715_v41  ;;  %p1250_p7 = por %p1249_p6, %p1248_p5 }
 0x155   :  { %671 = vmatprep.subr.bf16.mxu0 %v1416_v7 }
 0x156   :  { %p1251_p8 = pnand %p1250_p7, %p1244_p4 }
 0x158   :  { %672 = vmatpush1.bf16.msra.mxu0 %v1421_v9 }
 0x159   :  { %673 = vmatprep.subr.bf16.mxu0 %v1426_v11 }
 0x15c   :  { %674 = vmatpush1.bf16.msra.mxu0 %v1430_v13 }
 0x15d   :  { %675 = vmatprep.subr.bf16.mxu0 %v1438_v15 }
 0x160   :  { %676 = vmatpush1.bf16.msra.mxu0 %v1444_v17 }
 0x161   :  { %677 = vmatprep.subr.bf16.mxu0 %v1450_v19 }
 0x164   :  { %678 = vmatpush1.bf16.msra.mxu0 %v1454_v21 }
 0x165   :  { %679 = vmatprep.subr.bf16.mxu0 %v1462_v23 }
 0x168   :  { %680 = vmatpush1.bf16.msra.mxu0 %v1468_v25 }
 0x169   :  { %681 = vmatprep.subr.bf16.mxu0 %v1474_v27 }
 0x16c   :  { %682 = vmatpush1.bf16.msra.mxu0 %v1478_v31 }
 0x16d   :  { %683 = vmatprep.subr.bf16.mxu0 %v1486_v33 }
 0x170   :  { %684 = vmatpush1.bf16.msra.mxu0 %v1490_v35 }
 0x171   :  { %778 = vmatprep.subr.bf16.mxu0 %v1402_v2 }
 0x226   :  { %v1012_v0 = vpop.f32.mrb[4].mxu0 }
 0x227   :  { %v1013_v3 = vpop.f32.mrb[5].mxu0 }
 0x228   :  { %v1014_v36 = vadd.f32 %v1013_v3, %v1012_v0  ;;  %v1015_v37 = vpop.f32.mrb[6].mxu0 }
 0x229   :  { %v1016_v42 = vpop.f32.mrb[7].mxu0 }
 0x22a   :  { %v580_v43 = vadd.f32 %v1014_v36, %v1594_v34 }
 0x22c   :  { %585 = vadd.xlane.f32.xlu0 %v580_v43 }
 0x2b9   :  { %v586_v45 = vpop.xlane.xlu0 %585 }
 0x2ba   :  { %v588_v46 = vmul.f32 0.0078125, %v586_v45 }
 0x2bc   :  { %v589_v48 = vsub.f32 %v580_v43, %v588_v46 }
 0x2be   :  { %v590_v50 = vmul.f32 %v589_v48, %v589_v48 }
 0x2c0   :  { %591 = vadd.xlane.f32.xlu0 %v590_v50 }
 0x34d   :  { %v592_v51 = vpop.xlane.xlu0 %591 }
 0x34e   :  { %v593_v2 = vmul.f32 0.0078125, %v592_v51 }
 0x350   :  { %v594_v53 = vadd.f32 1e-05, %v593_v2 }
 0x352   :  { %1141 = vrsqrt.f32 %v594_v53 }
 0x35c   :  { %v1142_v54 = vpop.eup %1141 }
 0x35d   :  { %v596_v39 = vmul.f32 %v1142_v54, %v589_v48 }
 0x35f   :  { %v603_v0 = vmul.f32 %v1600_v38, %v596_v39 }
 0x361   :  { %v610_v3 = vadd.f32 %v1605_v40, %v603_v0 }
 0x363   :  { %611 = vst [vmem:[#allocation2 + $0x10] sm:$0xff] %v610_v3 }
 0x36a   :  { %v614_v36 = vld [vmem:[#allocation2 + $0x10] sm:$0x1]  ;;  %v618_v37 = vld [vmem:[#allocation2 + $0x13] sm:$0x3]   ;;  %v616_v42 = vld [vmem:[#allocation2 + $0x12] sm:$0x1] }
 0x36b   :  { %615 = vst [vmem:[#allocation4] sm:$0x1] %v614_v36  ;;  %619 = vst [vmem:[#allocation4 + $0x1] sm:$0x3] %v618_v37   ;;  %v770_v46 = vld [vmem:[#allocation2 + $0x11] sm:$0x1] }
 0x36c   :  { %617 = vst [vmem:[#allocation3 + $0x1] sm:$0x1] %v616_v42 }
 0x372   :  { %v626_v43 = vld [vmem:[#allocation4] sm:$0xff] }
 0x373   :  { %v624_v45 = vld [vmem:[#allocation3] sm:$0xff]  ;;  %v627_v48 = vpack.c.bf16 %v626_v43, %v626_v43 }
 0x374   :  { %v625_v50 = vpack.c.bf16 %v624_v45, %v624_v45  ;;  %771 = vst [vmem:[#allocation3] sm:$0x1] %v770_v46 }
 0x375   :  { %661 = vmatmul.mubr.bf16.vlgmr.msra.gmra.mrb[4].mxu1 %v627_v48 }
 0x376   :  { %702 = vmatmul.mubr.bf16.vlgmr.msra.gmra.mrb[8].mxu0 %v625_v50  ;;  %1019 = vmatpush3.bf16.msra.mxu1 %v1502_v49 }
 0x377   :  { %779 = vmatpush1.bf16.msra.mxu0 %v1407_v4  ;;  %1020 = vmatprep.subr.bf16.mxu1 %v1504_v52  ;;  %v1716_v4 = vld [vmem:[#allocation21_spill] sm:$0xff] }
 0x378   :  { %780 = vmatprep.subr.bf16.mxu0 %v1412_v6  ;;  %810 = vmatprep.mubr.bf16.mxu0 %v1715_v41  ;;  %v1717_v6 = vld [vmem:[#allocation19_spill] sm:$0xff] }
 0x37a   :  { %1021 = vmatpush3.bf16.msra.mxu1 %v1507_v55 }
 0x37b   :  { %781 = vmatpush1.bf16.msra.mxu0 %v1418_v8  ;;  %1022 = vmatprep.subr.bf16.mxu1 %v1510_v56  ;;  %v1718_v8 = vld [vmem:[#allocation18_spill] sm:$0xff] }
 0x37c   :  { %782 = vmatprep.subr.bf16.mxu0 %v1424_v10  ;;  %v1719_v10 = vld [vmem:[#allocation20_spill] sm:$0xff] }
 0x37e   :  { %1023 = vmatpush3.bf16.msra.mxu1 %v1516_v57 }
 0x37f   :  { %783 = vmatpush1.bf16.msra.mxu0 %v1428_v12  ;;  %1024 = vmatprep.subr.bf16.mxu1 %v1534_v58 }
 0x380   :  { %784 = vmatprep.subr.bf16.mxu0 %v1434_v14 }
 0x382   :  { %1025 = vmatpush3.bf16.msra.mxu1 %v1536_v59 }
 0x383   :  { %785 = vmatpush1.bf16.msra.mxu0 %v1440_v16  ;;  %1026 = vmatprep.subr.bf16.mxu1 %v1540_v60 }
 0x384   :  { %786 = vmatprep.subr.bf16.mxu0 %v1446_v18 }
 0x386   :  { %1027 = vmatpush3.bf16.msra.mxu1 %v1542_v61 }
 0x387   :  { %787 = vmatpush1.bf16.msra.mxu0 %v1452_v20  ;;  %1028 = vmatprep.subr.bf16.mxu1 %v1546_v62 }
 0x388   :  { %788 = vmatprep.subr.bf16.mxu0 %v1458_v22 }
 0x38a   :  { %1029 = vmatpush3.bf16.msra.mxu1 %v1548_v63 }
 0x38b   :  { %789 = vmatpush1.bf16.msra.mxu0 %v1464_v24  ;;  %1030 = vmatprep.subr.bf16.mxu1 %v1552_v1 }
 0x38c   :  { %790 = vmatprep.subr.bf16.mxu0 %v1470_v26 }
 0x38e   :  { %1031 = vmatpush3.bf16.msra.mxu1 %v1554_v28 }
 0x38f   :  { %791 = vmatpush1.bf16.msra.mxu0 %v1476_v30  ;;  %1032 = vmatprep.subr.bf16.mxu1 %v1558_v29 }
 0x390   :  { %792 = vmatprep.subr.bf16.mxu0 %v1482_v32 }
 0x392   :  { %1033 = vmatpush3.bf16.msra.mxu1 %v1716_v4 }
 0x393   :  { %793 = vmatpush1.bf16.msra.mxu0 %v1717_v6  ;;  %819 = vmatprep.subr.bf16.mxu1 %v1718_v8 }
 0x394   :  { %1040 = vmatprep.subr.bf16.mxu0 %v1719_v10 }
 0x448   :  { %v662_v12 = vpop.f32.mrb[4].mxu1 }
 0x449   :  { %v703_v14 = vpop.f32.mrb[8].mxu0  ;;  %v664_v18 = vpop.f32.mrb[5].mxu1 }
 0x44a   :  { %v704_v16 = vadd.f32 %v703_v14, %v662_v12  ;;  %v705_v20 = vpop.f32.mrb[9].mxu0  ;;  %v666_v24 = vpop.f32.mrb[6].mxu1 }
 0x44b   :  { %v706_v22 = vadd.f32 %v705_v20, %v664_v18  ;;  %v707_v26 = vpop.f32.mrb[10].mxu0  ;;  %v667_v51 = vpop.f32.mrb[7].mxu1  ;;  %v922_v20 = vld [vmem:[#allocation2 + $0x5] sm:$0x1] }
 0x44c   :  { %v710_v30 = vadd.f32 %v704_v16, %v1568_v44  ;;  %v708_v32 = vpop.f32.mrb[11].mxu0  ;;  %923 = vst [vmem:[#allocation13 + $0x1] sm:$0x1] %v922_v20 }
 0x44d   :  { %v711_v2 = vadd.f32 %v706_v22, %v1570_v47 }
 0x44e   :  { %1143 = vtanh.f32 %v710_v30 }
 0x44f   :  { %1145 = vtanh.f32 %v711_v2 }
 0x458   :  { %v1144_v53 = vpop.eup %1143 }
 0x459   :  { %v1146_v54 = vpop.eup %1145  ;;  %v714_v0 = vpack.c.bf16 %v1144_v53, %v1144_v53 }
 0x45a   :  { %v715_v39 = vpack.c.bf16 %v1146_v54, %v1146_v54 }
 0x45c   :  { %748 = vmatprep.mubr.bf16.mxu1 %v715_v39 }
 0x45d   :  { %749 = vmatmul.mubr.bf16.vlgmr.msra.gmra.mrb[8].mxu1 %v714_v0 }
 0x45e   :  { %820 = vmatpush1.bf16.msra.mxu1 %v1409_v5  ;;  %851 = vmatprep.mubr.bf16.mxu1 %v1715_v41  ;;  %v774_v5 = vld [vmem:[#allocation3] sm:$0xff] }
 0x45f   :  { %821 = vmatprep.subr.bf16.mxu1 %v1416_v7  ;;  %v775_v7 = vpack.c.bf16 %v774_v5, %v774_v5 }
 0x462   :  { %822 = vmatpush1.bf16.msra.mxu1 %v1421_v9 }
 0x463   :  { %823 = vmatprep.subr.bf16.mxu1 %v1426_v11 }
 0x466   :  { %824 = vmatpush1.bf16.msra.mxu1 %v1430_v13 }
 0x467   :  { %825 = vmatprep.subr.bf16.mxu1 %v1438_v15 }
 0x46a   :  { %826 = vmatpush1.bf16.msra.mxu1 %v1444_v17 }
 0x46b   :  { %827 = vmatprep.subr.bf16.mxu1 %v1450_v19 }
 0x46e   :  { %828 = vmatpush1.bf16.msra.mxu1 %v1454_v21 }
 0x46f   :  { %829 = vmatprep.subr.bf16.mxu1 %v1462_v23 }
 0x472   :  { %830 = vmatpush1.bf16.msra.mxu1 %v1468_v25 }
 0x473   :  { %831 = vmatprep.subr.bf16.mxu1 %v1474_v27 }
 0x476   :  { %832 = vmatpush1.bf16.msra.mxu1 %v1478_v31 }
 0x477   :  { %833 = vmatprep.subr.bf16.mxu1 %v1486_v33 }
 0x47a   :  { %834 = vmatpush1.bf16.msra.mxu1 %v1490_v35 }
 0x47d   :  { %852 = vmatmul.mubr.bf16.vlgmr.msra.gmra.mrb[12].mxu1 %v775_v7 }
 0x530   :  { %v1034_v9 = vpop.f32.mrb[8].mxu1 }
 0x531   :  { %v1035_v11 = vpop.f32.mrb[9].mxu1 }
 0x532   :  { %v1036_v13 = vadd.f32 %v1035_v11, %v1034_v9  ;;  %v1037_v15 = vpop.f32.mrb[10].mxu1 }
 0x533   :  { %v1038_v17 = vpop.f32.mrb[11].mxu1 }
 0x534   :  { %v751_v19 = vadd.f32 %v1036_v13, %v1594_v34 }
 0x536   :  { %756 = vadd.xlane.f32.xlu1 %v751_v19 }
 0x550   :  { %v853_v21 = vpop.f32.mrb[12].mxu1 }
 0x551   :  { %v855_v23 = vpop.f32.mrb[13].mxu1 }
 0x552   :  { %v857_v25 = vpop.f32.mrb[14].mxu1 }
 0x553   :  { %v858_v27 = vpop.f32.mrb[15].mxu1 }
 0x5c3   :  { %v757_v31 = vpop.xlane.xlu1 %756 }
 0x5c4   :  { %v758_v41 = vmul.f32 0.0078125, %v757_v31 }
 0x5c6   :  { %v759_v33 = vsub.f32 %v751_v19, %v758_v41 }
 0x5c8   :  { %v760_v3 = vmul.f32 %v759_v33, %v759_v33 }
 0x5ca   :  { %761 = vadd.xlane.f32.xlu1 %v760_v3 }
 0x657   :  { %v762_v35 = vpop.xlane.xlu1 %761 }
 0x658   :  { %v763_v36 = vmul.f32 0.0078125, %v762_v35 }
 0x65a   :  { %v764_v37 = vadd.f32 1e-05, %v763_v36 }
 0x65c   :  { %1147 = vrsqrt.f32 %v764_v37 }
 0x666   :  { %v1148_v42 = vpop.eup %1147 }
 0x667   :  { %v766_v43 = vmul.f32 %v1148_v42, %v759_v33 }
 0x669   :  { %v767_v45 = vmul.f32 %v1600_v38, %v766_v43 }
 0x66b   :  { %v768_v46 = vadd.f32 %v1605_v40, %v767_v45 }
 0x66d   :  { %769 = vst [vmem:[#allocation2 + $0x18] sm:$0xff] %v768_v46 }
 0x674   :  { %v772_v48 = vld [vmem:[#allocation2 + $0x18] sm:$0x1]  ;;  %v924_v50 = vld [vmem:[#allocation2 + $0x19] sm:$0x3]  }
 0x675   :  { %773 = vst [vmem:[#allocation4] sm:$0x1] %v772_v48  ;;  %925 = vst [vmem:[#allocation13 + $0x2] sm:$0x3] %v924_v50  }
 0x67c   :  { %v776_v6 = vld [vmem:[#allocation4] sm:$0xff] }
 0x67d   :  { %v777_v8 = vpack.c.bf16 %v776_v6, %v776_v6 }
 0x67f   :  { %811 = vmatmul.mubr.bf16.vlgmr.msra.gmra.mrb[12].mxu0 %v777_v8 }
 0x680   :  { %1041 = vmatpush3.bf16.msra.mxu0 %v1502_v49 }
 0x681   :  { %1042 = vmatprep.subr.bf16.mxu0 %v1504_v52 }
 0x684   :  { %1043 = vmatpush3.bf16.msra.mxu0 %v1507_v55 }
 0x685   :  { %1044 = vmatprep.subr.bf16.mxu0 %v1510_v56 }
 0x688   :  { %1045 = vmatpush3.bf16.msra.mxu0 %v1516_v57 }
 0x689   :  { %1046 = vmatprep.subr.bf16.mxu0 %v1534_v58 }
 0x68c   :  { %1047 = vmatpush3.bf16.msra.mxu0 %v1536_v59 }
 0x68d   :  { %1048 = vmatprep.subr.bf16.mxu0 %v1540_v60 }
 0x690   :  { %1049 = vmatpush3.bf16.msra.mxu0 %v1542_v61 }
 0x691   :  { %1050 = vmatprep.subr.bf16.mxu0 %v1546_v62 }
 0x694   :  { %1051 = vmatpush3.bf16.msra.mxu0 %v1548_v63 }
 0x695   :  { %1052 = vmatprep.subr.bf16.mxu0 %v1552_v1 }
 0x698   :  { %1053 = vmatpush3.bf16.msra.mxu0 %v1554_v28 }
 0x699   :  { %1054 = vmatprep.subr.bf16.mxu0 %v1558_v29 }
 0x69c   :  { %1055 = vmatpush3.bf16.msra.mxu0 %v1716_v4 }
 0x752   :  { %v812_v49 = vpop.f32.mrb[12].mxu0 }
 0x753   :  { %v854_v52 = vadd.f32 %v853_v21, %v812_v49  ;;  %v814_v55 = vpop.f32.mrb[13].mxu0 }
 0x754   :  { %v856_v56 = vadd.f32 %v855_v23, %v814_v55  ;;  %v816_v57 = vpop.f32.mrb[14].mxu0 }
 0x755   :  { %v860_v58 = vadd.f32 %v854_v52, %v1568_v44  ;;  %v817_v59 = vpop.f32.mrb[15].mxu0 }
 0x756   :  { %v861_v60 = vadd.f32 %v856_v56, %v1570_v47 }
 0x757   :  { %1149 = vtanh.f32 %v860_v58 }
 0x758   :  { %1151 = vtanh.f32 %v861_v60 }
 0x761   :  { %v1150_v61 = vpop.eup %1149 }
 0x762   :  { %v1152_v62 = vpop.eup %1151  ;;  %v864_v1 = vpack.c.bf16 %v1150_v61, %v1150_v61 }
 0x763   :  { %v865_v63 = vpack.c.bf16 %v1152_v62, %v1152_v62 }
 0x765   :  { %898 = vmatprep.mubr.bf16.mxu0 %v865_v63 }
 0x766   :  { %899 = vmatmul.mubr.bf16.vlgmr.msra.gmra.mrb[16].mxu0 %v864_v1 }
 0x839   :  { %v1056_v28 = vpop.f32.mrb[16].mxu0 }
 0x83a   :  { %v1057_v29 = vpop.f32.mrb[17].mxu0 }
 0x83b   :  { %v1058_v4 = vadd.f32 %v1057_v29, %v1056_v28  ;;  %v1059_v10 = vpop.f32.mrb[18].mxu0 }
 0x83c   :  { %v1060_v12 = vpop.f32.mrb[19].mxu0 }
 0x83d   :  { %v901_v14 = vadd.f32 %v1058_v4, %v1594_v34 }
 0x83f   :  { %906 = vadd.xlane.f32.xlu0 %v901_v14 }
 0x8cc   :  { %v907_v44 = vpop.xlane.xlu0 %906 }
 0x8cd   :  { %v908_v16 = vmul.f32 0.0078125, %v907_v44 }
 0x8cf   :  { %v909_v18 = vsub.f32 %v901_v14, %v908_v16 }
 0x8d1   :  { %v910_v47 = vmul.f32 %v909_v18, %v909_v18 }
 0x8d3   :  { %911 = vadd.xlane.f32.xlu1 %v910_v47 }
 0x960   :  { %v912_v22 = vpop.xlane.xlu1 %911 }
 0x961   :  { %v913_v24 = vmul.f32 0.0078125, %v912_v22 }
 0x963   :  { %v914_v26 = vadd.f32 1e-05, %v913_v24 }
 0x965   :  { %1153 = vrsqrt.f32 %v914_v26 }
 0x96f   :  { %v1154_v30 = vpop.eup %1153 }
 0x970   :  { %v916_v51 = vmul.f32 %v1154_v30, %v909_v18 }
 0x972   :  { %v917_v32 = vmul.f32 %v1600_v38, %v916_v51 }
 0x974   :  { %v918_v2 = vadd.f32 %v1605_v40, %v917_v32 }
 0x976   :  { %919 = vst [vmem:[#allocation2 + $0x20] sm:$0xff] %v918_v2 }
 0x97d   :  { %v920_v34 = vld [vmem:[#allocation2 + $0x20] sm:$0x1] }
 0x97e   :  { %921 = vst [vmem:[#allocation13] sm:$0x1] %v920_v34 }
 0x97f   :  { %1254 = shalt.err (!%p1251_p8)
}
 0x980   :  { %s1255_s20 = scalar_lea.hbm %s1703_s8, 64 }
 0x981   :  { %p1256_p9 = scmp.ne.s32.totalorder %s1703_s8, %s1255_s20  ;;  %p1259_p10 = scmp.lt.u32.totalorder %s1255_s20, %s1703_s8 }
 0x983   :  { %p1261_p11 = pnand %p1259_p10, %p1256_p9 }
 0x985   :  { %1264 = shalt.err (!%p1261_p11)
}
 0x986   :  { %937 = dma.vmem_to_hbm [thread:$0]  %s935_s7, 64, %s1703_s8, [#allocation7]  }
 0x987   :  { %1271 = dma.done.wait [#allocation7], 64  }
 0x988   :  { %1272 = vsyncadd [#allocation7], 4294967232 }
 0x989   :  { %941 = vsyncpa [#allocation6], 1 }
 0x98a   :  { %942 = vsyncpa [#allocation9], 1 }
 0x98b   :  { %943 = vsyncpa [#allocation12], 1 }
 0x98c   :  { %944 = vsyncpa [#allocation7], 1 }

</bundles_post_ra>
